<compile_context>
chip_gen: v7x
topology: tpu7x:2x2x1
jax: 0.10.0
libtpu: 0.0.40
codegen_flags: <defaults>
</compile_context>

<pallas_src>
import jax
import jax.numpy as jnp
from jax.experimental import pallas as pl
from jax.experimental.pallas import tpu as pltpu

_LANE = 128


def _mlp_kernel(x_ref,
                w1_ref, b1_ref,
                w2_ref, b2_ref,
                w3_ref, b3_ref,
                w4_ref, b4_ref,
                w5_ref, b5_ref,
                o_ref):
    """Full 5-layer MLP for one batch tile; weights/biases are VMEM-resident."""
    wdt = w1_ref.dtype  # MXU input dtype (f32 or bf16)

    h = x_ref[...]
    # Layer 1 + ReLU  (bias-add / ReLU stay in f32: safe on v5e, cheap everywhere)
    h = jnp.dot(h.astype(wdt), w1_ref[...], preferred_element_type=jnp.float32)
    h = jnp.maximum(h + b1_ref[...], 0.0)
    # Layer 2 + ReLU
    h = jnp.dot(h.astype(wdt), w2_ref[...], preferred_element_type=jnp.float32)
    h = jnp.maximum(h + b2_ref[...], 0.0)
    # Layer 3 + ReLU
    h = jnp.dot(h.astype(wdt), w3_ref[...], preferred_element_type=jnp.float32)
    h = jnp.maximum(h + b3_ref[...], 0.0)
    # Layer 4 + ReLU
    h = jnp.dot(h.astype(wdt), w4_ref[...], preferred_element_type=jnp.float32)
    h = jnp.maximum(h + b4_ref[...], 0.0)
    # Layer 5 (no activation; the module's Sigmoid is never applied in forward)
    h = jnp.dot(h.astype(wdt), w5_ref[...], preferred_element_type=jnp.float32)
    h = h + b5_ref[...]

    o_ref[...] = h.astype(o_ref.dtype)


def _round_up(n, m):
    return ((n + m - 1) // m) * m


def mlp_forward(x, params, *, compute_dtype=jnp.float32, max_tile_b=2048):
    """x: (B, proj_size); params: list of (W(in,out), b(1,out)) pairs."""
    B, in_dim = x.shape
    out_dim = params[-1][0].shape[1]  # 1

    # Lane-dense output: zero-pad the last layer's weight/bias to 128 output
    # lanes so the kernel writes full (tile_b, 128) slabs (unmasked vst).
    w5, b5 = params[-1]
    w5p = jnp.zeros((w5.shape[0], _LANE), w5.dtype).at[:, :out_dim].set(w5)
    b5p = jnp.zeros((1, _LANE), b5.dtype).at[:, :out_dim].set(b5)
    layers = list(params[:-1]) + [(w5p, b5p)]

    # Batch tiling: big tiles amortize per-step overhead; pad B to a multiple.
    tile_b = min(max_tile_b, _round_up(B, 8))
    b_pad = _round_up(B, tile_b)
    if b_pad != B:
        x = jnp.pad(x, ((0, b_pad - B), (0, 0)))
    x = x.astype(compute_dtype)

    flat = []
    in_specs = [pl.BlockSpec((tile_b, in_dim), lambda i: (i, 0))]
    flops = 0
    for w, b in layers:
        flat.append(w.astype(compute_dtype))   # MXU input dtype (f32 or bf16)
        flat.append(b.astype(jnp.float32))     # keep epilogue math in f32
        in_specs.append(pl.BlockSpec(w.shape, lambda i: (0, 0)))  # VMEM-resident
        in_specs.append(pl.BlockSpec(b.shape, lambda i: (0, 0)))  # VMEM-resident
        flops += 2 * b_pad * w.shape[0] * w.shape[1]

    bytes_accessed = (
        x.size * x.dtype.itemsize
        + sum(a.size * a.dtype.itemsize for a in flat)
        + b_pad * _LANE * 4
    )

    out = pl.pallas_call(
        _mlp_kernel,
        out_shape=jax.ShapeDtypeStruct((b_pad, _LANE), jnp.float32),
        grid=(b_pad // tile_b,),
        in_specs=in_specs,
        out_specs=pl.BlockSpec((tile_b, _LANE), lambda i: (i, 0)),
        compiler_params=pltpu.CompilerParams(
            dimension_semantics=("parallel",)),
        cost_estimate=pl.CostEstimate(
            flops=flops, transcendentals=0, bytes_accessed=bytes_accessed),
    )(x, *flat)

    return out[:B, :out_dim]


def init_params(key, proj_size, mid_size):
    """Deterministic init matching weights_init: W ~ N(0, 0.05), b = 0."""
    dims = [proj_size, 2 * mid_size, mid_size, mid_size // 2, mid_size // 4, 1]
    params = []
    for i in range(len(dims) - 1):
        key, sub = jax.random.split(key)
        w = 0.05 * jax.random.normal(sub, (dims[i], dims[i + 1]), dtype=jnp.float32)
        b = jnp.zeros((1, dims[i + 1]), dtype=jnp.float32)
        params.append((w, b))
    return params


def _ref_forward(x, params):
    """Pure-JAX f32 reference of the same math."""
    h = x
    for i, (w, b) in enumerate(params):
        h = h @ w + b
        if i < len(params) - 1:
            h = jnp.maximum(h, 0.0)
    return h


if __name__ == "__main__":
    # Small shapes consistent with the module: args.proj_size=32, args.mid_size=32
    proj_size = 32
    mid_size = 32
    batch = 8

    key = jax.random.PRNGKey(0)
    key, xkey, xkey2 = jax.random.split(key, 3)
    x = jax.random.normal(xkey, (batch, proj_size), dtype=jnp.float32)
    params = init_params(key, proj_size, mid_size)

    # f32 path: strict correctness check against the pure-JAX reference.
    out = mlp_forward(x, params, compute_dtype=jnp.float32)
    out = jax.block_until_ready(out)
    assert out.shape == (batch, 1), out.shape
    ref = _ref_forward(x, params)
    assert jnp.allclose(out, ref, atol=1e-5, rtol=1e-5)

    # bf16 streaming path at a realistic batch (exercises the batch grid and
    # megacore sharding: tile_b=2048, grid=(2,)); loose sanity check only.
    big_batch = 4096
    xb = jax.random.normal(xkey2, (big_batch, proj_size), dtype=jnp.float32)
    out_bf16 = mlp_forward(xb, params, compute_dtype=jnp.bfloat16)
    out_bf16 = jax.block_until_ready(out_bf16)
    assert out_bf16.shape == (big_batch, 1), out_bf16.shape
    ref_big = _ref_forward(xb, params)
    assert bool(jnp.all(jnp.isfinite(out_bf16)))
    assert jnp.allclose(out_bf16, ref_big, atol=2e-2, rtol=2e-2)

    print("KERNEL_OK")
</pallas_src>

<mosaic_0001>
module attributes {stable_mosaic.version = 11 : i64} {
  func.func @_mlp_kernel(%arg0: i32, %arg1: memref<8x32xf32, #tpu.memory_space<vmem>>, %arg2: memref<32x64xf32, #tpu.memory_space<vmem>>, %arg3: memref<1x64xf32, #tpu.memory_space<vmem>>, %arg4: memref<64x32xf32, #tpu.memory_space<vmem>>, %arg5: memref<1x32xf32, #tpu.memory_space<vmem>>, %arg6: memref<32x16xf32, #tpu.memory_space<vmem>>, %arg7: memref<1x16xf32, #tpu.memory_space<vmem>>, %arg8: memref<16x8xf32, #tpu.memory_space<vmem>>, %arg9: memref<1x8xf32, #tpu.memory_space<vmem>>, %arg10: memref<8x128xf32, #tpu.memory_space<vmem>>, %arg11: memref<1x128xf32, #tpu.memory_space<vmem>>, %arg12: memref<8x128xf32, #tpu.memory_space<vmem>>) attributes {dimension_semantics = [#tpu.dimension_semantics<parallel>], iteration_bounds = array<i64: 1>, scalar_prefetch = 0 : i64, scratch_operands = 0 : i64, tpu.core_type = #tpu.core_type<tc>, window_params = [{transform_indices = @transform_0, window_bounds = array<i64: 8, 32>}, {pipeline_mode = #tpu.pipeline_mode<synchronous>, transform_indices = @transform_1, window_bounds = array<i64: 32, 64>}, {pipeline_mode = #tpu.pipeline_mode<synchronous>, transform_indices = @transform_2, window_bounds = array<i64: 1, 64>}, {pipeline_mode = #tpu.pipeline_mode<synchronous>, transform_indices = @transform_3, window_bounds = array<i64: 64, 32>}, {pipeline_mode = #tpu.pipeline_mode<synchronous>, transform_indices = @transform_4, window_bounds = array<i64: 1, 32>}, {pipeline_mode = #tpu.pipeline_mode<synchronous>, transform_indices = @transform_5, window_bounds = array<i64: 32, 16>}, {pipeline_mode = #tpu.pipeline_mode<synchronous>, transform_indices = @transform_6, window_bounds = array<i64: 1, 16>}, {pipeline_mode = #tpu.pipeline_mode<synchronous>, transform_indices = @transform_7, window_bounds = array<i64: 16, 8>}, {pipeline_mode = #tpu.pipeline_mode<synchronous>, transform_indices = @transform_8, window_bounds = array<i64: 1, 8>}, {pipeline_mode = #tpu.pipeline_mode<synchronous>, transform_indices = @transform_9, window_bounds = array<i64: 8, 128>}, {pipeline_mode = #tpu.pipeline_mode<synchronous>, transform_indices = @transform_10, window_bounds = array<i64: 1, 128>}, {transform_indices = @transform_11, window_bounds = array<i64: 8, 128>}]} {
    %c0 = arith.constant 0 : index
    %c0_0 = arith.constant 0 : index
    %0 = vector.load %arg1[%c0, %c0_0] : memref<8x32xf32, #tpu.memory_space<vmem>>, vector<8x32xf32>
    %c0_1 = arith.constant 0 : index
    %c0_2 = arith.constant 0 : index
    %1 = vector.load %arg2[%c0_1, %c0_2] : memref<32x64xf32, #tpu.memory_space<vmem>>, vector<32x64xf32>
    %cst = arith.constant dense<0.000000e+00> : vector<8x64xf32>
    %2 = tpu.matmul %0, %1, %cst {dimension_numbers = #tpu.dot_dimension_numbers<[1], [0], [0], [1], [0, 0, 1, 1], [], []>} : vector<8x32xf32>, vector<32x64xf32>, vector<8x64xf32> -> vector<8x64xf32>
    %c0_3 = arith.constant 0 : index
    %c0_4 = arith.constant 0 : index
    %3 = vector.load %arg3[%c0_3, %c0_4] : memref<1x64xf32, #tpu.memory_space<vmem>>, vector<1x64xf32>
    %4 = vector.broadcast %3 : vector<1x64xf32> to vector<8x64xf32>
    %5 = arith.addf %2, %4 : vector<8x64xf32>
    %cst_5 = arith.constant 0.000000e+00 : f32
    %6 = vector.broadcast %cst_5 : f32 to vector<8x64xf32>
    %7 = arith.maximumf %5, %6 : vector<8x64xf32>
    %c0_6 = arith.constant 0 : index
    %c0_7 = arith.constant 0 : index
    %8 = vector.load %arg4[%c0_6, %c0_7] : memref<64x32xf32, #tpu.memory_space<vmem>>, vector<64x32xf32>
    %cst_8 = arith.constant dense<0.000000e+00> : vector<8x32xf32>
    %9 = tpu.matmul %7, %8, %cst_8 {dimension_numbers = #tpu.dot_dimension_numbers<[1], [0], [0], [1], [0, 0, 1, 1], [], []>} : vector<8x64xf32>, vector<64x32xf32>, vector<8x32xf32> -> vector<8x32xf32>
    %c0_9 = arith.constant 0 : index
    %c0_10 = arith.constant 0 : index
    %10 = vector.load %arg5[%c0_9, %c0_10] : memref<1x32xf32, #tpu.memory_space<vmem>>, vector<1x32xf32>
    %11 = vector.broadcast %10 : vector<1x32xf32> to vector<8x32xf32>
    %12 = arith.addf %9, %11 : vector<8x32xf32>
    %cst_11 = arith.constant 0.000000e+00 : f32
    %13 = vector.broadcast %cst_11 : f32 to vector<8x32xf32>
    %14 = arith.maximumf %12, %13 : vector<8x32xf32>
    %c0_12 = arith.constant 0 : index
    %c0_13 = arith.constant 0 : index
    %15 = vector.load %arg6[%c0_12, %c0_13] : memref<32x16xf32, #tpu.memory_space<vmem>>, vector<32x16xf32>
    %cst_14 = arith.constant dense<0.000000e+00> : vector<8x16xf32>
    %16 = tpu.matmul %14, %15, %cst_14 {dimension_numbers = #tpu.dot_dimension_numbers<[1], [0], [0], [1], [0, 0, 1, 1], [], []>} : vector<8x32xf32>, vector<32x16xf32>, vector<8x16xf32> -> vector<8x16xf32>
    %c0_15 = arith.constant 0 : index
    %c0_16 = arith.constant 0 : index
    %17 = vector.load %arg7[%c0_15, %c0_16] : memref<1x16xf32, #tpu.memory_space<vmem>>, vector<1x16xf32>
    %18 = vector.broadcast %17 : vector<1x16xf32> to vector<8x16xf32>
    %19 = arith.addf %16, %18 : vector<8x16xf32>
    %cst_17 = arith.constant 0.000000e+00 : f32
    %20 = vector.broadcast %cst_17 : f32 to vector<8x16xf32>
    %21 = arith.maximumf %19, %20 : vector<8x16xf32>
    %c0_18 = arith.constant 0 : index
    %c0_19 = arith.constant 0 : index
    %22 = vector.load %arg8[%c0_18, %c0_19] : memref<16x8xf32, #tpu.memory_space<vmem>>, vector<16x8xf32>
    %cst_20 = arith.constant dense<0.000000e+00> : vector<8x8xf32>
    %23 = tpu.matmul %21, %22, %cst_20 {dimension_numbers = #tpu.dot_dimension_numbers<[1], [0], [0], [1], [0, 0, 1, 1], [], []>} : vector<8x16xf32>, vector<16x8xf32>, vector<8x8xf32> -> vector<8x8xf32>
    %c0_21 = arith.constant 0 : index
    %c0_22 = arith.constant 0 : index
    %24 = vector.load %arg9[%c0_21, %c0_22] : memref<1x8xf32, #tpu.memory_space<vmem>>, vector<1x8xf32>
    %25 = vector.broadcast %24 : vector<1x8xf32> to vector<8x8xf32>
    %26 = arith.addf %23, %25 : vector<8x8xf32>
    %cst_23 = arith.constant 0.000000e+00 : f32
    %27 = vector.broadcast %cst_23 : f32 to vector<8x8xf32>
    %28 = arith.maximumf %26, %27 : vector<8x8xf32>
    %c0_24 = arith.constant 0 : index
    %c0_25 = arith.constant 0 : index
    %29 = vector.load %arg10[%c0_24, %c0_25] : memref<8x128xf32, #tpu.memory_space<vmem>>, vector<8x128xf32>
    %cst_26 = arith.constant dense<0.000000e+00> : vector<8x128xf32>
    %30 = tpu.matmul %28, %29, %cst_26 {dimension_numbers = #tpu.dot_dimension_numbers<[1], [0], [0], [1], [0, 0, 1, 1], [], []>} : vector<8x8xf32>, vector<8x128xf32>, vector<8x128xf32> -> vector<8x128xf32>
    %c0_27 = arith.constant 0 : index
    %c0_28 = arith.constant 0 : index
    %31 = vector.load %arg11[%c0_27, %c0_28] : memref<1x128xf32, #tpu.memory_space<vmem>>, vector<1x128xf32>
    %32 = vector.broadcast %31 : vector<1x128xf32> to vector<8x128xf32>
    %33 = arith.addf %30, %32 : vector<8x128xf32>
    %c0_29 = arith.constant 0 : index
    %c0_30 = arith.constant 0 : index
    %34 = vector.load %arg12[%c0_29, %c0_30] : memref<8x128xf32, #tpu.memory_space<vmem>>, vector<8x128xf32>
    tpu.vector_store %arg12[%c0_29, %c0_30], %33 {strides = array<i32>} : memref<8x128xf32, #tpu.memory_space<vmem>>, vector<8x128xf32>,
    return
  }
  func.func @transform_0(%arg0: i32) -> (i32, i32) {
    %c0_i32 = arith.constant 0 : i32
    %c0_i32_0 = arith.constant 0 : i32
    return %arg0, %c0_i32 : i32, i32
  }
  func.func @transform_1(%arg0: i32) -> (i32, i32) {
    %c0_i32 = arith.constant 0 : i32
    %c0_i32_0 = arith.constant 0 : i32
    %c0_i32_1 = arith.constant 0 : i32
    return %c0_i32, %c0_i32_0 : i32, i32
  }
  func.func @transform_2(%arg0: i32) -> (i32, i32) {
    %c0_i32 = arith.constant 0 : i32
    %c0_i32_0 = arith.constant 0 : i32
    %c0_i32_1 = arith.constant 0 : i32
    return %c0_i32, %c0_i32_0 : i32, i32
  }
  func.func @transform_3(%arg0: i32) -> (i32, i32) {
    %c0_i32 = arith.constant 0 : i32
    %c0_i32_0 = arith.constant 0 : i32
    %c0_i32_1 = arith.constant 0 : i32
    return %c0_i32, %c0_i32_0 : i32, i32
  }
  func.func @transform_4(%arg0: i32) -> (i32, i32) {
    %c0_i32 = arith.constant 0 : i32
    %c0_i32_0 = arith.constant 0 : i32
    %c0_i32_1 = arith.constant 0 : i32
    return %c0_i32, %c0_i32_0 : i32, i32
  }
  func.func @transform_5(%arg0: i32) -> (i32, i32) {
    %c0_i32 = arith.constant 0 : i32
    %c0_i32_0 = arith.constant 0 : i32
    %c0_i32_1 = arith.constant 0 : i32
    return %c0_i32, %c0_i32_0 : i32, i32
  }
  func.func @transform_6(%arg0: i32) -> (i32, i32) {
    %c0_i32 = arith.constant 0 : i32
    %c0_i32_0 = arith.constant 0 : i32
    %c0_i32_1 = arith.constant 0 : i32
    return %c0_i32, %c0_i32_0 : i32, i32
  }
  func.func @transform_7(%arg0: i32) -> (i32, i32) {
    %c0_i32 = arith.constant 0 : i32
    %c0_i32_0 = arith.constant 0 : i32
    %c0_i32_1 = arith.constant 0 : i32
    return %c0_i32, %c0_i32_0 : i32, i32
  }
  func.func @transform_8(%arg0: i32) -> (i32, i32) {
    %c0_i32 = arith.constant 0 : i32
    %c0_i32_0 = arith.constant 0 : i32
    %c0_i32_1 = arith.constant 0 : i32
    return %c0_i32, %c0_i32_0 : i32, i32
  }
  func.func @transform_9(%arg0: i32) -> (i32, i32) {
    %c0_i32 = arith.constant 0 : i32
    %c0_i32_0 = arith.constant 0 : i32
    %c0_i32_1 = arith.constant 0 : i32
    return %c0_i32, %c0_i32_0 : i32, i32
  }
  func.func @transform_10(%arg0: i32) -> (i32, i32) {
    %c0_i32 = arith.constant 0 : i32
    %c0_i32_0 = arith.constant 0 : i32
    %c0_i32_1 = arith.constant 0 : i32
    return %c0_i32, %c0_i32_0 : i32, i32
  }
  func.func @transform_11(%arg0: i32) -> (i32, i32) {
    %c0_i32 = arith.constant 0 : i32
    %c0_i32_0 = arith.constant 0 : i32
    return %arg0, %c0_i32 : i32, i32
  }
}

</mosaic_0001>

<bundles_post_ra>
// kernel: tpu_custom_call.1
= control target key start
LH: loop header
LB: loop body
LE: loop exit
PB: predicated region body
PF: predicated region fallthrough
CT: control target
= control target key end

     0   :  { %v624_v3 = vmov 0.0|0.0   ;;  %vm625_vm0 = vmmov 0   ;;  %v626_v6 = vmov 0.0   ;;  %s782_s0 = inlined_call_operand.vmem [shape: f32[8,32], index: 0, kind: input, shape index: {}]   ;;  %s783_s1 = inlined_call_operand.vmem [shape: f32[32,64], index: 1, kind: input, shape index: {}]   ;;  %s784_s2 = inlined_call_operand.vmem [shape: f32[1,64], index: 2, kind: input, shape index: {}]   ;;  %s785_s3 = inlined_call_operand.vmem [shape: f32[64,32], index: 3, kind: input, shape index: {}]   ;;  %s786_s4 = inlined_call_operand.vmem [shape: f32[1,32], index: 4, kind: input, shape index: {}]   ;;  %s787_s5 = inlined_call_operand.vmem [shape: f32[32,16], index: 5, kind: input, shape index: {}]   ;;  %s788_s6 = inlined_call_operand.vmem [shape: f32[1,16], index: 6, kind: input, shape index: {}]   ;;  %s789_s7 = inlined_call_operand.vmem [shape: f32[16,8], index: 7, kind: input, shape index: {}]   ;;  %s790_s8 = inlined_call_operand.vmem [shape: f32[1,8], index: 8, kind: input, shape index: {}]   ;;  %s791_s9 = inlined_call_operand.vmem [shape: f32[8,128], index: 9, kind: input, shape index: {}]   ;;  %s792_s10 = inlined_call_operand.vmem [shape: f32[1,128], index: 10, kind: input, shape index: {}]   ;;  %s793_s11 = inlined_call_operand.hbm [shape: f32[8,128], index: 11, kind: output, shape index: {}]  }
   0x1   :  { %v40_v0 = vld [vmem:[%s783_s1] sm:$0xff]  ;;  %v41_v1 = vld [vmem:[%s783_s1 + $0x8] sm:$0xff]  ;;  %v42_v2 = vld [vmem:[%s783_s1 + $0x10] sm:$0xff]  ;;  %569 = vmatprep.subr.bf16.mxu0 %v624_v3  ;;  %524 = vmatprep.mubr.msk.f32.mxu0 %vm625_vm0, %v626_v6 }
   0x2   :  { %v570_v4 = vpack.c.bf16 %v41_v1, %v40_v0  ;;  %v43_v5 = vld [vmem:[%s783_s1 + $0x18] sm:$0xff]  ;;  %v126_v7 = vld [vmem:[%s785_s3] sm:$0xff]  ;;  %575 = vmatprep.subr.bf16.mxu1 %v624_v3  ;;  %v127_v8 = vld [vmem:[%s785_s3 + $0x8] sm:$0xff]  ;;  %543 = vmatprep.mubr.msk.f32.mxu1 %vm625_vm0, %v626_v6 }
   0x3   :  { %v128_v9 = vld [vmem:[%s785_s3 + $0x10] sm:$0xff]  ;;  %v129_v10 = vld [vmem:[%s785_s3 + $0x18] sm:$0xff]  ;;  %v573_v11 = vpack.c.bf16 %v43_v5, %v42_v2  ;;  %v576_v12 = vpack.c.bf16 %v127_v8, %v126_v7 }
   0x4   :  { %571 = vmatpush3.bf16.msra.mxu0 %v570_v4 }
   0x5   :  { %572 = vmatprep.subr.bf16.mxu0 %v624_v3 }
   0x6   :  { %16 = vsyncpa [#allocation3], 0  ;;  %577 = vmatpush3.bf16.msra.mxu1 %v576_v12  ;;  %v579_v13 = vpack.c.bf16 %v129_v10, %v128_v9  ;;  %v130_v14 = vld [vmem:[%s785_s3 + $0x20] sm:$0xff]  ;;  %v131_v15 = vld [vmem:[%s785_s3 + $0x28] sm:$0xff]  ;;  %vm51_vm1 = vcmask 261120   ;;  %vm141_vm2 = vcmask 523264  }
   0x7   :  { %578 = vmatprep.subr.bf16.mxu1 %v624_v3  ;;  %v39_v16 = vld [vmem:[%s782_s0] sm:$0xff]  ;;  %v582_v17 = vpack.c.bf16 %v131_v15, %v130_v14  ;;  %v132_v18 = vld [vmem:[%s785_s3 + $0x30] sm:$0xff]  ;;  %v133_v19 = vld [vmem:[%s785_s3 + $0x38] sm:$0xff]  ;;  %vm310_vm3 = vcmask 130048   ;;  %vm393_vm4 = vcmask 64512   ;;  %s627_s20 = smov [#allocation2]  }
   0x8   :  { %574 = vmatpush3.bf16.msra.mxu0 %v573_v11  ;;  %v585_v20 = vpack.c.bf16 %v133_v19, %v132_v18  ;;  %v216_v21 = vld [vmem:[%s787_s5] sm:$0xff]  ;;  %v217_v22 = vld [vmem:[%s787_s5 + $0x8] sm:$0xff]  ;;  %v218_v29 = vld [vmem:[%s787_s5 + $0x10] sm:$0xff]  ;;  %s474_s21 = sshll.u32 %s627_s20, 4  ;;  %s475_s21 = int_to_ptr.vmem [resolvable:$true] %s474_s21 }
   0x9   :  { %587 = vmatprep.subr.bf16.mxu0 %v624_v3  ;;  %v588_v23 = vpack.c.bf16 %v217_v22, %v216_v21  ;;  %v482_v24 = vld [vmem:[%s784_s2] ss:$0 sm:$0xff]  ;;  %v219_v30 = vld [vmem:[%s787_s5 + $0x18] sm:$0xff]  ;;  %v302_v38 = vld [vmem:[%s789_s7 + $0x8] sm:$0xff]  ;;  %p605_p1 = scmp.lt.s32.totalorder %s475_s21, %s475_s21 }
   0xa   :  { %580 = vmatpush3.bf16.msra.mxu1 %v579_v13  ;;  %v591_v31 = vpack.c.bf16 %v219_v30, %v218_v29  ;;  %v484_v32 = vld [vmem:[%s786_s4] ss:$0 sm:$0xff] }
   0xb   :  { %525 = vmatmul.mubr.msk.f32.vlgmr.msra.gmra.mrb[0].mxu0 %vm51_vm1, %v39_v16  ;;  %581 = vmatprep.subr.bf16.mxu1 %v624_v3  ;;  %v301_v37 = vld [vmem:[%s789_s7] sm:$0xff] }
   0xc   :  { %554 = vmatprep.mubr.msk.f32.mxu0 %vm625_vm0, %v626_v6  ;;  %589 = vmatpush3.bf16.msra.mxu0 %v588_v23  ;;  %v594_v39 = vpack.c.bf16 %v302_v38, %v301_v37  ;;  %v486_v40 = vld [vmem:[%s788_s6] ss:$0 sm:$0xff] }
   0xd   :  { %590 = vmatprep.subr.bf16.mxu0 %v624_v3  ;;  %v385_v45 = vld [vmem:[%s791_s9] sm:$0xff]  ;;  %s600_s9 = scalar_lea.vmem %s475_s21, 128 }
   0xe   :  { %583 = vmatpush3.bf16.msra.mxu1 %v582_v17  ;;  %v488_v46 = vld [vmem:[%s790_s8] ss:$0 sm:$0xff]  ;;  %p601_p0 = scmp.ne.s32.totalorder %s475_s21, %s600_s9  ;;  %p606_p2 = scmp.lt.s32.totalorder %s600_s9, %s600_s9 }
   0xf   :  { %584 = vmatprep.subr.bf16.mxu1 %v624_v3  ;;  %v490_v51 = vld [vmem:[%s792_s10] ss:$0 sm:$0xff] }
  0x10   :  { %592 = vmatpush3.bf16.msra.mxu0 %v591_v31  ;;  %p607_p3 = por %p606_p2, %p605_p1 }
  0x11   :  { %593 = vmatprep.subr.bf16.mxu0 %v624_v3 }
  0x12   :  { %586 = vmatpush3.bf16.msra.mxu1 %v585_v20  ;;  %p608_p4 = pnand %p607_p3, %p601_p0 }
  0x13   :  { %564 = vmatprep.subr.mxu1 %v626_v6 }
  0xde   :  { %v121_v25 = vpop.f32.mrb[0].mxu0 }
  0xdf   :  { %v122_v26 = vadd.f32 %v482_v24, %v121_v25  ;;  %v526_v27 = vpop.f32.mrb[1].mxu0 }
  0xe1   :  { %v125_v28 = vmax.f32 %v122_v26, 0.0 }
  0xe3   :  { %544 = vmatmul.mubr.msk.f32.vlgmr.msra.gmra.mrb[0].mxu1 %vm141_vm2, %v125_v28 }
  0xe4   :  { %566 = vmatprep.mubr.msk.f32.mxu1 %vm625_vm0, %v626_v6  ;;  %565 = vmatpush3.msra.mxu1 %v385_v45 }
 0x1b6   :  { %v211_v33 = vpop.f32.mrb[0].mxu1 }
 0x1b7   :  { %v212_v34 = vadd.f32 %v484_v32, %v211_v33  ;;  %v545_v35 = vpop.f32.mrb[1].mxu1 }
 0x1b9   :  { %v215_v36 = vmax.f32 %v212_v34, 0.0 }
 0x1bb   :  { %555 = vmatmul.mubr.msk.f32.vlgmr.msra.gmra.mrb[2].mxu0 %vm51_vm1, %v215_v36 }
 0x1bc   :  { %561 = vmatprep.mubr.msk.f32.mxu0 %vm625_vm0, %v626_v6  ;;  %595 = vmatpush3.bf16.msra.mxu0 %v594_v39 }
 0x28e   :  { %v296_v41 = vpop.f32.mrb[2].mxu0 }
 0x28f   :  { %v297_v42 = vadd.f32 %v486_v40, %v296_v41  ;;  %v556_v43 = vpop.f32.mrb[3].mxu0 }
 0x291   :  { %v300_v44 = vmax.f32 %v297_v42, 0.0 }
 0x293   :  { %562 = vmatmul.mubr.msk.f32.vlgmr.msra.gmra.mrb[4].mxu0 %vm310_vm3, %v300_v44 }
 0x366   :  { %v380_v47 = vpop.f32.mrb[4].mxu0 }
 0x367   :  { %v381_v48 = vadd.f32 %v488_v46, %v380_v47  ;;  %v563_v49 = vpop.f32.mrb[5].mxu0 }
 0x369   :  { %v384_v50 = vmax.f32 %v381_v48, 0.0 }
 0x36b   :  { %567 = vmatmul.mubr.msk.f32.vlgmr.msra.gmra.mrb[2].mxu1 %vm393_vm4, %v384_v50 }
 0x43e   :  { %v463_v52 = vpop.f32.mrb[2].mxu1 }
 0x43f   :  { %v464_v53 = vadd.f32 %v490_v51, %v463_v52  ;;  %v568_v54 = vpop.f32.mrb[3].mxu1 }
 0x441   :  { %467 = vst [vmem:[#allocation2] sm:$0xff] %v464_v53 }
 0x442   :  { %611 = shalt.err (!%p608_p4)
}
 0x443   :  { %s612_s0 = scalar_lea.hbm %s793_s11, 128 }
 0x444   :  { %p613_p5 = scmp.ne.s32.totalorder %s793_s11, %s612_s0  ;;  %p616_p6 = scmp.lt.u32.totalorder %s612_s0, %s793_s11 }
 0x446   :  { %p618_p7 = pnand %p616_p6, %p613_p5 }
 0x448   :  { %621 = shalt.err (!%p618_p7)
}
 0x449   :  { %477 = dma.vmem_to_hbm [thread:$0]  %s475_s21, 128, %s793_s11, [#allocation3]  }
 0x44a   :  { %622 = dma.done.wait [#allocation3], 128  }
 0x44b   :  { %623 = vsyncadd [#allocation3], 4294967168 }
 0x44c   :  { %481 = vsyncpa [#allocation3], 1 }

</bundles_post_ra>
